<compile_context>
chip_gen: v7x
topology: tpu7x:2x2x1
jax: 0.10.0
libtpu: 0.0.40
codegen_flags: <defaults>
</compile_context>

<pallas_src>
import functools

import jax
import jax.numpy as jnp
from jax.experimental import pallas as pl
from jax.experimental.pallas import tpu as pltpu

# ----------------------------- model config ---------------------------------
categorical_cols = ["col0", "col1", "col2", "col3"]
NUM_FEATURES = len(categorical_cols)
VOCAB_SIZES = [7, 11, 5, 13]
EMB_DIM = 16
HIDDEN_DIM = 32
BATCH = 2
SEQ_LEN = 8
D_IN = EMB_DIM * NUM_FEATURES          # LSTM input size
V_TOTAL = sum(VOCAB_SIZES)             # concatenated output logits width
G4 = 4 * HIDDEN_DIM                    # gate width (= 128 lanes exactly)


def _round_up(x, m):
    return ((x + m - 1) // m) * m


B_PAD = _round_up(BATCH, 8)            # sublane-dense batch (pad rows discarded)
V_PAD = _round_up(V_TOTAL, 128)        # lane-dense output head (pad cols sliced off)


# ------------------------------ Pallas kernel --------------------------------
def lstm_decode_kernel(xw_ref,      # (T*Bp, 4H) f32 : x @ W_ih^T + (b_ih+b_hh), time-major
                       w_ref,       # (H, 4H+V_PAD) bf16 : [ W_hh^T | W_out^T(padded) ]
                       bout_ref,    # (1, V_PAD) f32 : zero-padded concat output biases
                       logits_ref,  # (Bp, V_PAD) f32 output (lane-dense)
                       *, T, Bp, H, Vp):
    # Static lane slices of the packed weight buffer (bf16 MXU operands).
    whh = w_ref[:, 0:4 * H]                 # (H, 4H)   bf16
    wout = w_ref[:, 4 * H:4 * H + Vp]       # (H, V_PAD) bf16

    xw = xw_ref[...]                         # (T*Bp, 4H) f32, bias already folded

    # h / c live in vregs as f32; fully unrolled time loop with static,
    # sublane-aligned (one-vreg) slices of xw.
    h = jnp.zeros((Bp, H), jnp.float32)
    c = jnp.zeros((Bp, H), jnp.float32)
    for t in range(T):
        # Only the tiny (Bp,H)@(H,4H) recurrent matmul sits on the serial
        # h->h chain; operands bf16, accumulation f32.
        gates = xw[t * Bp:(t + 1) * Bp, :] + jnp.dot(
            h.astype(jnp.bfloat16), whh,
            preferred_element_type=jnp.float32)                 # (Bp, 4H) f32
        # sigmoid(x) = 0.5*tanh(0.5*x)+0.5 : single EUP pass over the full
        # 128-lane gate vreg instead of exp + reciprocal.
        sg = 0.5 * jnp.tanh(0.5 * gates) + 0.5
        # PyTorch LSTM gate order: input, forget, cell, output.
        i_g = sg[:, 0 * H:1 * H]
        f_g = sg[:, 1 * H:2 * H]
        g_g = jnp.tanh(gates[:, 2 * H:3 * H])                   # tanh on g slice only
        o_g = sg[:, 3 * H:4 * H]
        c = f_g * c + i_g * g_g
        h = o_g * jnp.tanh(c)

    # Final hidden state -> all output heads at once (lane-dense store).
    logits_ref[...] = jnp.dot(h.astype(jnp.bfloat16), wout,
                              preferred_element_type=jnp.float32) + bout_ref[...]


def run_lstm_head(xw_flat, w_packed, bout_pad, *, T, Bp):
    """xw_flat: (T*Bp, 4H) f32 time-major pre-projected input (bias folded).
    Returns (Bp, V_PAD) f32 logits."""
    vmem = pl.BlockSpec(memory_space=pltpu.MemorySpace.VMEM)
    kernel = functools.partial(lstm_decode_kernel, T=T, Bp=Bp,
                               H=HIDDEN_DIM, Vp=bout_pad.shape[1])
    # NOTE: no grid / no scratch -- the whole problem (~40 KB) lives in VMEM.
    # At large batch, add a leading "parallel" grid axis over batch tiles and
    # re-derive the tile size against v7x's 64 MiB physical VMEM.
    return pl.pallas_call(
        kernel,
        out_shape=jax.ShapeDtypeStruct((Bp, bout_pad.shape[1]), jnp.float32),
        in_specs=[vmem, vmem, vmem],
        out_specs=vmem,
    )(xw_flat, w_packed, bout_pad)


# ------------------------------ parameter init --------------------------------
def init_params(key):
    keys = jax.random.split(key, 16)
    k_iter = iter(keys)

    emb_tables = [
        0.1 * jax.random.normal(next(k_iter), (v, EMB_DIM), jnp.float32)
        for v in VOCAB_SIZES
    ]
    # PyTorch layout: W_ih (4H, D_in), W_hh (4H, H); we work with transposes.
    w_ih = 0.1 * jax.random.normal(next(k_iter), (G4, D_IN), jnp.float32)
    w_hh = 0.1 * jax.random.normal(next(k_iter), (G4, HIDDEN_DIM), jnp.float32)
    b_ih = 0.05 * jax.random.normal(next(k_iter), (G4,), jnp.float32)
    b_hh = 0.05 * jax.random.normal(next(k_iter), (G4,), jnp.float32)

    w_outs = [
        0.1 * jax.random.normal(next(k_iter), (v, HIDDEN_DIM), jnp.float32)
        for v in VOCAB_SIZES
    ]
    b_outs = [
        0.05 * jax.random.normal(next(k_iter), (v,), jnp.float32)
        for v in VOCAB_SIZES
    ]

    wih_t = w_ih.T                                      # (D_in, 4H)
    whh_t = w_hh.T                                      # (H, 4H)
    b_comb = (b_ih + b_hh)                              # (4H,)

    # Fold W_ih into the embedding tables: fused[i] = emb[i] @ W_ih^T slice.
    # Combined LSTM bias is folded into feature 0's table (added once per gather).
    fused_tables = []
    for i in range(NUM_FEATURES):
        f = emb_tables[i] @ wih_t[i * EMB_DIM:(i + 1) * EMB_DIM, :]   # (vocab_i, 4H)
        if i == 0:
            f = f + b_comb[None, :]
        fused_tables.append(f.astype(jnp.float32))

    wout = jnp.concatenate([w.T for w in w_outs], axis=1)            # (H, V_total)
    bout = jnp.concatenate(b_outs).reshape(1, V_TOTAL)               # (1, V_total)
    # Zero-pad the output head to a lane-dense width; padding sliced off later.
    wout_pad = jnp.pad(wout, ((0, 0), (0, V_PAD - V_TOTAL)))
    bout_pad = jnp.pad(bout, ((0, 0), (0, V_PAD - V_TOTAL)))

    # Pack W_hh^T and the padded output head lane-wise into ONE bf16 buffer
    # (fewer DMA descriptors; bf16 MXU operands, half the weight bytes).
    w_packed = jnp.concatenate([whh_t, wout_pad], axis=1).astype(jnp.bfloat16)  # (H, 4H+V_PAD)

    params = dict(
        # kernel-side (fused / packed) parameters
        fused_tables=fused_tables,
        w_packed=w_packed,
        bout_pad=bout_pad.astype(jnp.float32),
        # original-layout parameters, kept for the pure-JAX reference
        emb_tables=emb_tables,
        wih_t=wih_t,
        whh_t=whh_t,
        b_comb=b_comb.reshape(1, G4),
        wout=wout,
        bout=bout,
    )
    return params


# ------------------------------- forward pass ---------------------------------
@jax.jit
def forward(params, x):
    """x: (B, T, F) int32 categorical indices. Returns dict col -> (B, vocab)."""
    B, T, _ = x.shape
    Bp = _round_up(B, 8)

    # Pad the tiny int32 index tensor (not float activations); pad rows gather
    # index 0 (always valid) and their results are discarded below.
    x_tbf = jnp.transpose(x, (1, 0, 2))                   # (T, B, F) int32
    x_tbf = jnp.pad(x_tbf, ((0, 0), (0, Bp - B), (0, 0)))  # (T, Bp, F)

    # Gather the W_ih-fused tables and sum over features -> pre-projected
    # gate input (bias already folded into feature 0's table).
    xw = params["fused_tables"][0][x_tbf[:, :, 0]]         # (T, Bp, 4H)
    for i in range(1, NUM_FEATURES):
        xw = xw + params["fused_tables"][i][x_tbf[:, :, i]]
    xw_flat = xw.reshape(T * Bp, G4)                       # time-major, f32

    logits_all = run_lstm_head(
        xw_flat, params["w_packed"], params["bout_pad"], T=T, Bp=Bp,
    )                                                      # (Bp, V_PAD)

    out = {}
    off = 0
    for col, v in zip(categorical_cols, VOCAB_SIZES):
        out[col] = logits_all[:B, off:off + v]
        off += v
    return out


# --------------------------- pure-JAX reference --------------------------------
def forward_reference(params, x):
    """Plain-JAX f32 LSTM reference matching the PyTorch module (DROP=False)."""
    embedded = [jnp.take(params["emb_tables"][i], x[:, :, i], axis=0)
                for i in range(NUM_FEATURES)]
    x_embed = jnp.concatenate(embedded, axis=-1)           # (B, T, D_in)
    B, T, _ = x_embed.shape
    H = HIDDEN_DIM
    h = jnp.zeros((B, H), jnp.float32)
    c = jnp.zeros((B, H), jnp.float32)
    for t in range(T):
        gates = (x_embed[:, t, :] @ params["wih_t"]
                 + h @ params["whh_t"] + params["b_comb"])
        i_g = jax.nn.sigmoid(gates[:, 0 * H:1 * H])
        f_g = jax.nn.sigmoid(gates[:, 1 * H:2 * H])
        g_g = jnp.tanh(gates[:, 2 * H:3 * H])
        o_g = jax.nn.sigmoid(gates[:, 3 * H:4 * H])
        c = f_g * c + i_g * g_g
        h = o_g * jnp.tanh(c)
    logits = h @ params["wout"] + params["bout"]
    out = {}
    off = 0
    for col, v in zip(categorical_cols, VOCAB_SIZES):
        out[col] = logits[:, off:off + v]
        off += v
    return out


# ----------------------------------- main --------------------------------------
if __name__ == "__main__":
    key = jax.random.PRNGKey(0)
    k_param, k_data = jax.random.split(key)

    params = init_params(k_param)

    # Categorical indices, one column per feature, each within its vocab.
    cols = []
    data_keys = jax.random.split(k_data, NUM_FEATURES)
    for i, v in enumerate(VOCAB_SIZES):
        cols.append(jax.random.randint(data_keys[i], (BATCH, SEQ_LEN), 0, v,
                                       dtype=jnp.int32))
    x = jnp.stack(cols, axis=-1)                           # (B, T, F) int32

    out = forward(params, x)
    jax.block_until_ready(out)

    ref = forward_reference(params, x)
    jax.block_until_ready(ref)

    # Tolerance sized for bf16 MXU operands (f32 accumulation, f32 gate math)
    # compounding across the T=8 recurrent chain.
    for col, v in zip(categorical_cols, VOCAB_SIZES):
        assert out[col].shape == (BATCH, v), (col, out[col].shape)
        assert jnp.allclose(out[col], ref[col], rtol=2e-2, atol=3e-3), (
            col, jnp.max(jnp.abs(out[col] - ref[col])))

    print("KERNEL_OK")
</pallas_src>

<mosaic_0001>
module attributes {stable_mosaic.version = 11 : i64} {
  func.func @lstm_decode_kernel(%arg0: memref<64x128xf32, #tpu.memory_space<vmem>>, %arg1: memref<32x256xbf16, #tpu.memory_space<vmem>>, %arg2: memref<1x128xf32, #tpu.memory_space<vmem>>, %arg3: memref<8x128xf32, #tpu.memory_space<vmem>>) attributes {dimension_semantics = [], scalar_prefetch = 0 : i64, scratch_operands = 0 : i64, tpu.core_type = #tpu.core_type<tc>} {
    %c0 = arith.constant 0 : index
    %c0_0 = arith.constant 0 : index
    %0 = vector.load %arg1[%c0, %c0_0] : memref<32x256xbf16, #tpu.memory_space<vmem>>, vector<32x128xbf16>
    %c0_1 = arith.constant 0 : index
    %c128 = arith.constant 128 : index
    %1 = vector.load %arg1[%c0_1, %c128] : memref<32x256xbf16, #tpu.memory_space<vmem>>, vector<32x128xbf16>
    %c0_2 = arith.constant 0 : index
    %c0_3 = arith.constant 0 : index
    %2 = vector.load %arg0[%c0_2, %c0_3] : memref<64x128xf32, #tpu.memory_space<vmem>>, vector<64x128xf32>
    %cst = arith.constant 0.000000e+00 : f32
    %3 = vector.broadcast %cst : f32 to vector<8x32xf32>
    %cst_4 = arith.constant 0.000000e+00 : f32
    %4 = vector.broadcast %cst_4 : f32 to vector<8x32xf32>
    %5 = vector.extract_strided_slice %2 {offsets = [0, 0], sizes = [8, 128], strides = [1, 1]} : vector<64x128xf32> to vector<8x128xf32>
    %6 = arith.truncf %3 : vector<8x32xf32> to vector<8x32xbf16>
    %cst_5 = arith.constant dense<0.000000e+00> : vector<8x128xf32>
    %7 = tpu.matmul %6, %0, %cst_5 {dimension_numbers = #tpu.dot_dimension_numbers<[1], [0], [0], [1], [0, 0, 1, 1], [], []>} : vector<8x32xbf16>, vector<32x128xbf16>, vector<8x128xf32> -> vector<8x128xf32>
    %8 = arith.addf %5, %7 : vector<8x128xf32>
    %cst_6 = arith.constant 5.000000e-01 : f32
    %9 = vector.broadcast %cst_6 : f32 to vector<8x128xf32>
    %10 = arith.mulf %9, %8 : vector<8x128xf32>
    %11 = math.tanh %10 : vector<8x128xf32>
    %cst_7 = arith.constant 5.000000e-01 : f32
    %12 = vector.broadcast %cst_7 : f32 to vector<8x128xf32>
    %13 = arith.mulf %12, %11 : vector<8x128xf32>
    %cst_8 = arith.constant 5.000000e-01 : f32
    %14 = vector.broadcast %cst_8 : f32 to vector<8x128xf32>
    %15 = arith.addf %13, %14 : vector<8x128xf32>
    %16 = vector.extract_strided_slice %15 {offsets = [0, 0], sizes = [8, 32], strides = [1, 1]} : vector<8x128xf32> to vector<8x32xf32>
    %17 = vector.extract_strided_slice %15 {offsets = [0, 32], sizes = [8, 32], strides = [1, 1]} : vector<8x128xf32> to vector<8x32xf32>
    %18 = vector.extract_strided_slice %8 {offsets = [0, 64], sizes = [8, 32], strides = [1, 1]} : vector<8x128xf32> to vector<8x32xf32>
    %19 = math.tanh %18 : vector<8x32xf32>
    %20 = vector.extract_strided_slice %15 {offsets = [0, 96], sizes = [8, 32], strides = [1, 1]} : vector<8x128xf32> to vector<8x32xf32>
    %21 = arith.mulf %17, %4 : vector<8x32xf32>
    %22 = arith.mulf %16, %19 : vector<8x32xf32>
    %23 = arith.addf %21, %22 : vector<8x32xf32>
    %24 = math.tanh %23 : vector<8x32xf32>
    %25 = arith.mulf %20, %24 : vector<8x32xf32>
    %26 = vector.extract_strided_slice %2 {offsets = [8, 0], sizes = [8, 128], strides = [1, 1]} : vector<64x128xf32> to vector<8x128xf32>
    %27 = arith.truncf %25 : vector<8x32xf32> to vector<8x32xbf16>
    %cst_9 = arith.constant dense<0.000000e+00> : vector<8x128xf32>
    %28 = tpu.matmul %27, %0, %cst_9 {dimension_numbers = #tpu.dot_dimension_numbers<[1], [0], [0], [1], [0, 0, 1, 1], [], []>} : vector<8x32xbf16>, vector<32x128xbf16>, vector<8x128xf32> -> vector<8x128xf32>
    %29 = arith.addf %26, %28 : vector<8x128xf32>
    %cst_10 = arith.constant 5.000000e-01 : f32
    %30 = vector.broadcast %cst_10 : f32 to vector<8x128xf32>
    %31 = arith.mulf %30, %29 : vector<8x128xf32>
    %32 = math.tanh %31 : vector<8x128xf32>
    %cst_11 = arith.constant 5.000000e-01 : f32
    %33 = vector.broadcast %cst_11 : f32 to vector<8x128xf32>
    %34 = arith.mulf %33, %32 : vector<8x128xf32>
    %cst_12 = arith.constant 5.000000e-01 : f32
    %35 = vector.broadcast %cst_12 : f32 to vector<8x128xf32>
    %36 = arith.addf %34, %35 : vector<8x128xf32>
    %37 = vector.extract_strided_slice %36 {offsets = [0, 0], sizes = [8, 32], strides = [1, 1]} : vector<8x128xf32> to vector<8x32xf32>
    %38 = vector.extract_strided_slice %36 {offsets = [0, 32], sizes = [8, 32], strides = [1, 1]} : vector<8x128xf32> to vector<8x32xf32>
    %39 = vector.extract_strided_slice %29 {offsets = [0, 64], sizes = [8, 32], strides = [1, 1]} : vector<8x128xf32> to vector<8x32xf32>
    %40 = math.tanh %39 : vector<8x32xf32>
    %41 = vector.extract_strided_slice %36 {offsets = [0, 96], sizes = [8, 32], strides = [1, 1]} : vector<8x128xf32> to vector<8x32xf32>
    %42 = arith.mulf %38, %23 : vector<8x32xf32>
    %43 = arith.mulf %37, %40 : vector<8x32xf32>
    %44 = arith.addf %42, %43 : vector<8x32xf32>
    %45 = math.tanh %44 : vector<8x32xf32>
    %46 = arith.mulf %41, %45 : vector<8x32xf32>
    %47 = vector.extract_strided_slice %2 {offsets = [16, 0], sizes = [8, 128], strides = [1, 1]} : vector<64x128xf32> to vector<8x128xf32>
    %48 = arith.truncf %46 : vector<8x32xf32> to vector<8x32xbf16>
    %cst_13 = arith.constant dense<0.000000e+00> : vector<8x128xf32>
    %49 = tpu.matmul %48, %0, %cst_13 {dimension_numbers = #tpu.dot_dimension_numbers<[1], [0], [0], [1], [0, 0, 1, 1], [], []>} : vector<8x32xbf16>, vector<32x128xbf16>, vector<8x128xf32> -> vector<8x128xf32>
    %50 = arith.addf %47, %49 : vector<8x128xf32>
    %cst_14 = arith.constant 5.000000e-01 : f32
    %51 = vector.broadcast %cst_14 : f32 to vector<8x128xf32>
    %52 = arith.mulf %51, %50 : vector<8x128xf32>
    %53 = math.tanh %52 : vector<8x128xf32>
    %cst_15 = arith.constant 5.000000e-01 : f32
    %54 = vector.broadcast %cst_15 : f32 to vector<8x128xf32>
    %55 = arith.mulf %54, %53 : vector<8x128xf32>
    %cst_16 = arith.constant 5.000000e-01 : f32
    %56 = vector.broadcast %cst_16 : f32 to vector<8x128xf32>
    %57 = arith.addf %55, %56 : vector<8x128xf32>
    %58 = vector.extract_strided_slice %57 {offsets = [0, 0], sizes = [8, 32], strides = [1, 1]} : vector<8x128xf32> to vector<8x32xf32>
    %59 = vector.extract_strided_slice %57 {offsets = [0, 32], sizes = [8, 32], strides = [1, 1]} : vector<8x128xf32> to vector<8x32xf32>
    %60 = vector.extract_strided_slice %50 {offsets = [0, 64], sizes = [8, 32], strides = [1, 1]} : vector<8x128xf32> to vector<8x32xf32>
    %61 = math.tanh %60 : vector<8x32xf32>
    %62 = vector.extract_strided_slice %57 {offsets = [0, 96], sizes = [8, 32], strides = [1, 1]} : vector<8x128xf32> to vector<8x32xf32>
    %63 = arith.mulf %59, %44 : vector<8x32xf32>
    %64 = arith.mulf %58, %61 : vector<8x32xf32>
    %65 = arith.addf %63, %64 : vector<8x32xf32>
    %66 = math.tanh %65 : vector<8x32xf32>
    %67 = arith.mulf %62, %66 : vector<8x32xf32>
    %68 = vector.extract_strided_slice %2 {offsets = [24, 0], sizes = [8, 128], strides = [1, 1]} : vector<64x128xf32> to vector<8x128xf32>
    %69 = arith.truncf %67 : vector<8x32xf32> to vector<8x32xbf16>
    %cst_17 = arith.constant dense<0.000000e+00> : vector<8x128xf32>
    %70 = tpu.matmul %69, %0, %cst_17 {dimension_numbers = #tpu.dot_dimension_numbers<[1], [0], [0], [1], [0, 0, 1, 1], [], []>} : vector<8x32xbf16>, vector<32x128xbf16>, vector<8x128xf32> -> vector<8x128xf32>
    %71 = arith.addf %68, %70 : vector<8x128xf32>
    %cst_18 = arith.constant 5.000000e-01 : f32
    %72 = vector.broadcast %cst_18 : f32 to vector<8x128xf32>
    %73 = arith.mulf %72, %71 : vector<8x128xf32>
    %74 = math.tanh %73 : vector<8x128xf32>
    %cst_19 = arith.constant 5.000000e-01 : f32
    %75 = vector.broadcast %cst_19 : f32 to vector<8x128xf32>
    %76 = arith.mulf %75, %74 : vector<8x128xf32>
    %cst_20 = arith.constant 5.000000e-01 : f32
    %77 = vector.broadcast %cst_20 : f32 to vector<8x128xf32>
    %78 = arith.addf %76, %77 : vector<8x128xf32>
    %79 = vector.extract_strided_slice %78 {offsets = [0, 0], sizes = [8, 32], strides = [1, 1]} : vector<8x128xf32> to vector<8x32xf32>
    %80 = vector.extract_strided_slice %78 {offsets = [0, 32], sizes = [8, 32], strides = [1, 1]} : vector<8x128xf32> to vector<8x32xf32>
    %81 = vector.extract_strided_slice %71 {offsets = [0, 64], sizes = [8, 32], strides = [1, 1]} : vector<8x128xf32> to vector<8x32xf32>
    %82 = math.tanh %81 : vector<8x32xf32>
    %83 = vector.extract_strided_slice %78 {offsets = [0, 96], sizes = [8, 32], strides = [1, 1]} : vector<8x128xf32> to vector<8x32xf32>
    %84 = arith.mulf %80, %65 : vector<8x32xf32>
    %85 = arith.mulf %79, %82 : vector<8x32xf32>
    %86 = arith.addf %84, %85 : vector<8x32xf32>
    %87 = math.tanh %86 : vector<8x32xf32>
    %88 = arith.mulf %83, %87 : vector<8x32xf32>
    %89 = vector.extract_strided_slice %2 {offsets = [32, 0], sizes = [8, 128], strides = [1, 1]} : vector<64x128xf32> to vector<8x128xf32>
    %90 = arith.truncf %88 : vector<8x32xf32> to vector<8x32xbf16>
    %cst_21 = arith.constant dense<0.000000e+00> : vector<8x128xf32>
    %91 = tpu.matmul %90, %0, %cst_21 {dimension_numbers = #tpu.dot_dimension_numbers<[1], [0], [0], [1], [0, 0, 1, 1], [], []>} : vector<8x32xbf16>, vector<32x128xbf16>, vector<8x128xf32> -> vector<8x128xf32>
    %92 = arith.addf %89, %91 : vector<8x128xf32>
    %cst_22 = arith.constant 5.000000e-01 : f32
    %93 = vector.broadcast %cst_22 : f32 to vector<8x128xf32>
    %94 = arith.mulf %93, %92 : vector<8x128xf32>
    %95 = math.tanh %94 : vector<8x128xf32>
    %cst_23 = arith.constant 5.000000e-01 : f32
    %96 = vector.broadcast %cst_23 : f32 to vector<8x128xf32>
    %97 = arith.mulf %96, %95 : vector<8x128xf32>
    %cst_24 = arith.constant 5.000000e-01 : f32
    %98 = vector.broadcast %cst_24 : f32 to vector<8x128xf32>
    %99 = arith.addf %97, %98 : vector<8x128xf32>
    %100 = vector.extract_strided_slice %99 {offsets = [0, 0], sizes = [8, 32], strides = [1, 1]} : vector<8x128xf32> to vector<8x32xf32>
    %101 = vector.extract_strided_slice %99 {offsets = [0, 32], sizes = [8, 32], strides = [1, 1]} : vector<8x128xf32> to vector<8x32xf32>
    %102 = vector.extract_strided_slice %92 {offsets = [0, 64], sizes = [8, 32], strides = [1, 1]} : vector<8x128xf32> to vector<8x32xf32>
    %103 = math.tanh %102 : vector<8x32xf32>
    %104 = vector.extract_strided_slice %99 {offsets = [0, 96], sizes = [8, 32], strides = [1, 1]} : vector<8x128xf32> to vector<8x32xf32>
    %105 = arith.mulf %101, %86 : vector<8x32xf32>
    %106 = arith.mulf %100, %103 : vector<8x32xf32>
    %107 = arith.addf %105, %106 : vector<8x32xf32>
    %108 = math.tanh %107 : vector<8x32xf32>
    %109 = arith.mulf %104, %108 : vector<8x32xf32>
    %110 = vector.extract_strided_slice %2 {offsets = [40, 0], sizes = [8, 128], strides = [1, 1]} : vector<64x128xf32> to vector<8x128xf32>
    %111 = arith.truncf %109 : vector<8x32xf32> to vector<8x32xbf16>
    %cst_25 = arith.constant dense<0.000000e+00> : vector<8x128xf32>
    %112 = tpu.matmul %111, %0, %cst_25 {dimension_numbers = #tpu.dot_dimension_numbers<[1], [0], [0], [1], [0, 0, 1, 1], [], []>} : vector<8x32xbf16>, vector<32x128xbf16>, vector<8x128xf32> -> vector<8x128xf32>
    %113 = arith.addf %110, %112 : vector<8x128xf32>
    %cst_26 = arith.constant 5.000000e-01 : f32
    %114 = vector.broadcast %cst_26 : f32 to vector<8x128xf32>
    %115 = arith.mulf %114, %113 : vector<8x128xf32>
    %116 = math.tanh %115 : vector<8x128xf32>
    %cst_27 = arith.constant 5.000000e-01 : f32
    %117 = vector.broadcast %cst_27 : f32 to vector<8x128xf32>
    %118 = arith.mulf %117, %116 : vector<8x128xf32>
    %cst_28 = arith.constant 5.000000e-01 : f32
    %119 = vector.broadcast %cst_28 : f32 to vector<8x128xf32>
    %120 = arith.addf %118, %119 : vector<8x128xf32>
    %121 = vector.extract_strided_slice %120 {offsets = [0, 0], sizes = [8, 32], strides = [1, 1]} : vector<8x128xf32> to vector<8x32xf32>
    %122 = vector.extract_strided_slice %120 {offsets = [0, 32], sizes = [8, 32], strides = [1, 1]} : vector<8x128xf32> to vector<8x32xf32>
    %123 = vector.extract_strided_slice %113 {offsets = [0, 64], sizes = [8, 32], strides = [1, 1]} : vector<8x128xf32> to vector<8x32xf32>
    %124 = math.tanh %123 : vector<8x32xf32>
    %125 = vector.extract_strided_slice %120 {offsets = [0, 96], sizes = [8, 32], strides = [1, 1]} : vector<8x128xf32> to vector<8x32xf32>
    %126 = arith.mulf %122, %107 : vector<8x32xf32>
    %127 = arith.mulf %121, %124 : vector<8x32xf32>
    %128 = arith.addf %126, %127 : vector<8x32xf32>
    %129 = math.tanh %128 : vector<8x32xf32>
    %130 = arith.mulf %125, %129 : vector<8x32xf32>
    %131 = vector.extract_strided_slice %2 {offsets = [48, 0], sizes = [8, 128], strides = [1, 1]} : vector<64x128xf32> to vector<8x128xf32>
    %132 = arith.truncf %130 : vector<8x32xf32> to vector<8x32xbf16>
    %cst_29 = arith.constant dense<0.000000e+00> : vector<8x128xf32>
    %133 = tpu.matmul %132, %0, %cst_29 {dimension_numbers = #tpu.dot_dimension_numbers<[1], [0], [0], [1], [0, 0, 1, 1], [], []>} : vector<8x32xbf16>, vector<32x128xbf16>, vector<8x128xf32> -> vector<8x128xf32>
    %134 = arith.addf %131, %133 : vector<8x128xf32>
    %cst_30 = arith.constant 5.000000e-01 : f32
    %135 = vector.broadcast %cst_30 : f32 to vector<8x128xf32>
    %136 = arith.mulf %135, %134 : vector<8x128xf32>
    %137 = math.tanh %136 : vector<8x128xf32>
    %cst_31 = arith.constant 5.000000e-01 : f32
    %138 = vector.broadcast %cst_31 : f32 to vector<8x128xf32>
    %139 = arith.mulf %138, %137 : vector<8x128xf32>
    %cst_32 = arith.constant 5.000000e-01 : f32
    %140 = vector.broadcast %cst_32 : f32 to vector<8x128xf32>
    %141 = arith.addf %139, %140 : vector<8x128xf32>
    %142 = vector.extract_strided_slice %141 {offsets = [0, 0], sizes = [8, 32], strides = [1, 1]} : vector<8x128xf32> to vector<8x32xf32>
    %143 = vector.extract_strided_slice %141 {offsets = [0, 32], sizes = [8, 32], strides = [1, 1]} : vector<8x128xf32> to vector<8x32xf32>
    %144 = vector.extract_strided_slice %134 {offsets = [0, 64], sizes = [8, 32], strides = [1, 1]} : vector<8x128xf32> to vector<8x32xf32>
    %145 = math.tanh %144 : vector<8x32xf32>
    %146 = vector.extract_strided_slice %141 {offsets = [0, 96], sizes = [8, 32], strides = [1, 1]} : vector<8x128xf32> to vector<8x32xf32>
    %147 = arith.mulf %143, %128 : vector<8x32xf32>
    %148 = arith.mulf %142, %145 : vector<8x32xf32>
    %149 = arith.addf %147, %148 : vector<8x32xf32>
    %150 = math.tanh %149 : vector<8x32xf32>
    %151 = arith.mulf %146, %150 : vector<8x32xf32>
    %152 = vector.extract_strided_slice %2 {offsets = [56, 0], sizes = [8, 128], strides = [1, 1]} : vector<64x128xf32> to vector<8x128xf32>
    %153 = arith.truncf %151 : vector<8x32xf32> to vector<8x32xbf16>
    %cst_33 = arith.constant dense<0.000000e+00> : vector<8x128xf32>
    %154 = tpu.matmul %153, %0, %cst_33 {dimension_numbers = #tpu.dot_dimension_numbers<[1], [0], [0], [1], [0, 0, 1, 1], [], []>} : vector<8x32xbf16>, vector<32x128xbf16>, vector<8x128xf32> -> vector<8x128xf32>
    %155 = arith.addf %152, %154 : vector<8x128xf32>
    %cst_34 = arith.constant 5.000000e-01 : f32
    %156 = vector.broadcast %cst_34 : f32 to vector<8x128xf32>
    %157 = arith.mulf %156, %155 : vector<8x128xf32>
    %158 = math.tanh %157 : vector<8x128xf32>
    %cst_35 = arith.constant 5.000000e-01 : f32
    %159 = vector.broadcast %cst_35 : f32 to vector<8x128xf32>
    %160 = arith.mulf %159, %158 : vector<8x128xf32>
    %cst_36 = arith.constant 5.000000e-01 : f32
    %161 = vector.broadcast %cst_36 : f32 to vector<8x128xf32>
    %162 = arith.addf %160, %161 : vector<8x128xf32>
    %163 = vector.extract_strided_slice %162 {offsets = [0, 0], sizes = [8, 32], strides = [1, 1]} : vector<8x128xf32> to vector<8x32xf32>
    %164 = vector.extract_strided_slice %162 {offsets = [0, 32], sizes = [8, 32], strides = [1, 1]} : vector<8x128xf32> to vector<8x32xf32>
    %165 = vector.extract_strided_slice %155 {offsets = [0, 64], sizes = [8, 32], strides = [1, 1]} : vector<8x128xf32> to vector<8x32xf32>
    %166 = math.tanh %165 : vector<8x32xf32>
    %167 = vector.extract_strided_slice %162 {offsets = [0, 96], sizes = [8, 32], strides = [1, 1]} : vector<8x128xf32> to vector<8x32xf32>
    %168 = arith.mulf %164, %149 : vector<8x32xf32>
    %169 = arith.mulf %163, %166 : vector<8x32xf32>
    %170 = arith.addf %168, %169 : vector<8x32xf32>
    %171 = math.tanh %170 : vector<8x32xf32>
    %172 = arith.mulf %167, %171 : vector<8x32xf32>
    %173 = arith.truncf %172 : vector<8x32xf32> to vector<8x32xbf16>
    %cst_37 = arith.constant dense<0.000000e+00> : vector<8x128xf32>
    %174 = tpu.matmul %173, %1, %cst_37 {dimension_numbers = #tpu.dot_dimension_numbers<[1], [0], [0], [1], [0, 0, 1, 1], [], []>} : vector<8x32xbf16>, vector<32x128xbf16>, vector<8x128xf32> -> vector<8x128xf32>
    %c0_38 = arith.constant 0 : index
    %c0_39 = arith.constant 0 : index
    %175 = vector.load %arg2[%c0_38, %c0_39] : memref<1x128xf32, #tpu.memory_space<vmem>>, vector<1x128xf32>
    %176 = vector.broadcast %175 : vector<1x128xf32> to vector<8x128xf32>
    %177 = arith.addf %174, %176 : vector<8x128xf32>
    %c0_40 = arith.constant 0 : index
    %c0_41 = arith.constant 0 : index
    %178 = vector.load %arg3[%c0_40, %c0_41] : memref<8x128xf32, #tpu.memory_space<vmem>>, vector<8x128xf32>
    tpu.vector_store %arg3[%c0_40, %c0_41], %177 {strides = array<i32>} : memref<8x128xf32, #tpu.memory_space<vmem>>, vector<8x128xf32>,
    return
  }
}

</mosaic_0001>

<bundles_post_ra>
// kernel: forward.1
= control target key start
LH: loop header
LB: loop body
LE: loop exit
PB: predicated region body
PF: predicated region fallthrough
CT: control target
= control target key end

     0   :  { %v840_v0 = vmov 0.0   ;;  %vm841_vm0 = vmmov 0   ;;  %v842_v3 = vmov 0   ;;  %s843_s18 = smov 64   ;;  %s844_s19 = smov 32   ;;  %vm43_vm1 = vcmask 261120   ;;  %s1003_s1 = inlined_call_operand.vmem [shape: bf16[32,256], index: 1, kind: input, shape index: {}]   ;;  %s1004_s0 = inlined_call_operand.vmem [shape: f32[64,128], index: 0, kind: input, shape index: {}]   ;;  %s1005_s2 = inlined_call_operand.vmem [shape: f32[1,128], index: 2, kind: input, shape index: {}]   ;;  %s1006_s3 = inlined_call_operand.vmem [shape: f32[8,128], index: 3, kind: output, shape index: {}]  }
   0x1   :  { %711 = vmatprep.subr.bf16.mxu0 %v840_v0  ;;  %v869_v1 = vld [vmem:[%s1003_s1] ss:$8 sps:$4 sm:$0xff]   ;;  %715 = vmatprep.mubr.msk.bf16.mxu0 %vm841_vm0, %v840_v0  ;;  %v880_v2 = vld [vmem:[%s1003_s1 + $0x10] ss:$8 sps:$4 sm:$0xff]  }
   0x2   :  { %719 = vmatprep.subr.bf16.mxu1 %v840_v0  ;;  %723 = vmatprep.mubr.msk.bf16.mxu1 %vm841_vm0, %v840_v0  ;;  %v23_v4 = vld [vmem:[%s1004_s0] sm:$0xff]  ;;  %v24_v25 = vld [vmem:[%s1004_s0 + $0x8] sm:$0xff]  ;;  %v25_v46 = vld [vmem:[%s1004_s0 + $0x10] sm:$0xff] }
   0x3   :  { %712 = vmatpush3.bf16.msra.mxu0 %v869_v1  ;;  %720 = vmatpush3.bf16.msra.mxu1 %v869_v1 }
   0x4   :  { %713 = vmatprep.subr.bf16.mxu0 %v840_v0  ;;  %721 = vmatprep.subr.bf16.mxu1 %v840_v0 }
   0x7   :  { %714 = vmatpush3.bf16.msra.mxu0 %v880_v2  ;;  %722 = vmatpush3.bf16.msra.mxu1 %v880_v2 }
   0x8   :  { %727 = vmatprep.subr.bf16.mxu0 %v840_v0  ;;  %735 = vmatprep.subr.bf16.mxu1 %v840_v0 }
   0xa   :  { %716 = vmatmul.mubr.bf16.vlgmr.msra.gmra.mrb[0].mxu0 %v842_v3 }
   0xb   :  { %728 = vmatpush3.bf16.msra.mxu0 %v869_v1  ;;  %731 = vmatprep.mubr.msk.bf16.mxu0 %vm841_vm0, %v840_v0 }
   0xc   :  { %729 = vmatprep.subr.bf16.mxu0 %v840_v0 }
   0xf   :  { %730 = vmatpush3.bf16.msra.mxu0 %v880_v2 }
  0x10   :  { %743 = vmatprep.subr.bf16.mxu0 %v840_v0 }
  0xdd   :  { %v81_v5 = vpop.f32.mrb[0].mxu0 }
  0xde   :  { %v87_v6 = vadd.f32 %v81_v5, %v23_v4  ;;  %v717_v7 = vpop.f32.mrb[1].mxu0 }
  0xdf   :  { %v84_v8 = vpop.f32.mrb[2].mxu0 }
  0xe0   :  { %792 = vtanh.f32 %v87_v6  ;;  %v718_v9 = vpop.f32.mrb[3].mxu0  ;;  %v88_v11 = vmul.f32 0.5, %v87_v6  ;;  %v26_v6 = vld [vmem:[%s1004_s0 + $0x18] sm:$0xff] }
  0xe2   :  { %794 = vtanh.f32 %v88_v11 }
  0xea   :  { %v793_v10 = vpop.eup %792 }
  0xeb   :  { %95 = vrot.lane.b32.xlu0 %v793_v10, %s843_s18 }
  0xec   :  { %v795_v12 = vpop.eup %794 }
  0xed   :  { %v90_v13 = vmul.f32 0.5, %v795_v12 }
  0xef   :  { %v91_v14 = vadd.f32 0.5, %v90_v13 }
  0xf1   :  { %v93_v17 = vmul.f32 0.0, %v91_v14 }
 0x15d   :  { %v96_v15 = vpop.permute.xlu0 %95 }
 0x15e   :  { %v98_v16 = vmul.f32 %v96_v15, %v91_v14 }
 0x160   :  { %100 = vrot.lane.b32.xlu0 %v98_v16, %s844_s19 }
 0x1d2   :  { %v101_v18 = vpop.permute.xlu0 %100 }
 0x1d3   :  { %v103_v19 = vadd.f32 %v101_v18, %v93_v17 }
 0x1d5   :  { %796 = vtanh.f32 %v103_v19 }
 0x1df   :  { %v797_v20 = vpop.eup %796 }
 0x1e0   :  { %106 = vrot.lane.b32.xlu1 %v797_v20, %s843_s18 }
 0x252   :  { %v107_v21 = vpop.permute.xlu1 %106 }
 0x253   :  { %v109_v22 = vmul.f32 %v107_v21, %v91_v14 }
 0x255   :  { %v110_v23 = vpack.c.bf16 %v109_v22, %v109_v22 }
 0x257   :  { %112 = vrot.lane.b32.xlu1 %v110_v23, %s844_s19 }
 0x2c9   :  { %v113_v24 = vpop.permute.xlu1 %112 }
 0x2ca   :  { %724 = vmatmul.mubr.msk.bf16.vlgmr.msra.gmra.mrb[0].mxu1 %vm43_vm1, %v113_v24 }
 0x2cb   :  { %736 = vmatpush3.bf16.msra.mxu1 %v869_v1  ;;  %739 = vmatprep.mubr.msk.bf16.mxu1 %vm841_vm0, %v840_v0 }
 0x2cc   :  { %737 = vmatprep.subr.bf16.mxu1 %v840_v0 }
 0x2cf   :  { %738 = vmatpush3.bf16.msra.mxu1 %v880_v2 }
 0x2d0   :  { %751 = vmatprep.subr.bf16.mxu1 %v840_v0 }
 0x39d   :  { %v151_v26 = vpop.f32.mrb[0].mxu1 }
 0x39e   :  { %v157_v27 = vadd.f32 %v151_v26, %v24_v25  ;;  %v725_v28 = vpop.f32.mrb[1].mxu1 }
 0x39f   :  { %v154_v29 = vpop.f32.mrb[2].mxu1 }
 0x3a0   :  { %798 = vtanh.f32 %v157_v27  ;;  %v726_v30 = vpop.f32.mrb[3].mxu1  ;;  %v158_v32 = vmul.f32 0.5, %v157_v27  ;;  %v27_v27 = vld [vmem:[%s1004_s0 + $0x20] sm:$0xff] }
 0x3a2   :  { %800 = vtanh.f32 %v158_v32 }
 0x3aa   :  { %v799_v31 = vpop.eup %798 }
 0x3ab   :  { %165 = vrot.lane.b32.xlu0 %v799_v31, %s843_s18 }
 0x3ac   :  { %v801_v33 = vpop.eup %800 }
 0x3ad   :  { %v160_v34 = vmul.f32 0.5, %v801_v33 }
 0x3af   :  { %v161_v35 = vadd.f32 0.5, %v160_v34 }
 0x3b1   :  { %v163_v38 = vmul.f32 %v161_v35, %v103_v19 }
 0x41d   :  { %v166_v36 = vpop.permute.xlu0 %165 }
 0x41e   :  { %v168_v37 = vmul.f32 %v166_v36, %v161_v35 }
 0x420   :  { %170 = vrot.lane.b32.xlu1 %v168_v37, %s844_s19 }
 0x492   :  { %v171_v39 = vpop.permute.xlu1 %170 }
 0x493   :  { %v173_v40 = vadd.f32 %v171_v39, %v163_v38 }
 0x495   :  { %802 = vtanh.f32 %v173_v40 }
 0x49f   :  { %v803_v41 = vpop.eup %802 }
 0x4a0   :  { %176 = vrot.lane.b32.xlu0 %v803_v41, %s843_s18 }
 0x512   :  { %v177_v42 = vpop.permute.xlu0 %176 }
 0x513   :  { %v179_v43 = vmul.f32 %v177_v42, %v161_v35 }
 0x515   :  { %v180_v44 = vpack.c.bf16 %v179_v43, %v179_v43 }
 0x517   :  { %182 = vrot.lane.b32.xlu1 %v180_v44, %s844_s19 }
 0x589   :  { %v183_v45 = vpop.permute.xlu1 %182 }
 0x58a   :  { %732 = vmatmul.mubr.msk.bf16.vlgmr.msra.gmra.mrb[4].mxu0 %vm43_vm1, %v183_v45 }
 0x58b   :  { %744 = vmatpush3.bf16.msra.mxu0 %v869_v1  ;;  %747 = vmatprep.mubr.msk.bf16.mxu0 %vm841_vm0, %v840_v0 }
 0x58c   :  { %745 = vmatprep.subr.bf16.mxu0 %v840_v0 }
 0x58f   :  { %746 = vmatpush3.bf16.msra.mxu0 %v880_v2 }
 0x590   :  { %759 = vmatprep.subr.bf16.mxu0 %v840_v0 }
 0x65d   :  { %v221_v47 = vpop.f32.mrb[4].mxu0 }
 0x65e   :  { %v227_v48 = vadd.f32 %v221_v47, %v25_v46  ;;  %v733_v49 = vpop.f32.mrb[5].mxu0 }
 0x65f   :  { %v224_v50 = vpop.f32.mrb[6].mxu0 }
 0x660   :  { %804 = vtanh.f32 %v227_v48  ;;  %v734_v51 = vpop.f32.mrb[7].mxu0  ;;  %v228_v53 = vmul.f32 0.5, %v227_v48  ;;  %v28_v48 = vld [vmem:[%s1004_s0 + $0x28] sm:$0xff] }
 0x662   :  { %806 = vtanh.f32 %v228_v53 }
 0x66a   :  { %v805_v52 = vpop.eup %804 }
 0x66b   :  { %235 = vrot.lane.b32.xlu0 %v805_v52, %s843_s18 }
 0x66c   :  { %v807_v54 = vpop.eup %806 }
 0x66d   :  { %v230_v55 = vmul.f32 0.5, %v807_v54 }
 0x66f   :  { %v231_v56 = vadd.f32 0.5, %v230_v55 }
 0x671   :  { %v233_v59 = vmul.f32 %v231_v56, %v173_v40 }
 0x6dd   :  { %v236_v57 = vpop.permute.xlu0 %235 }
 0x6de   :  { %v238_v58 = vmul.f32 %v236_v57, %v231_v56 }
 0x6e0   :  { %240 = vrot.lane.b32.xlu1 %v238_v58, %s844_s19 }
 0x752   :  { %v241_v60 = vpop.permute.xlu1 %240 }
 0x753   :  { %v243_v61 = vadd.f32 %v241_v60, %v233_v59 }
 0x755   :  { %808 = vtanh.f32 %v243_v61 }
 0x75f   :  { %v809_v62 = vpop.eup %808 }
 0x760   :  { %246 = vrot.lane.b32.xlu0 %v809_v62, %s843_s18 }
 0x7d2   :  { %v247_v63 = vpop.permute.xlu0 %246 }
 0x7d3   :  { %v249_v3 = vmul.f32 %v247_v63, %v231_v56 }
 0x7d5   :  { %v250_v4 = vpack.c.bf16 %v249_v3, %v249_v3 }
 0x7d7   :  { %252 = vrot.lane.b32.xlu1 %v250_v4, %s844_s19 }
 0x849   :  { %v253_v5 = vpop.permute.xlu1 %252 }
 0x84a   :  { %740 = vmatmul.mubr.msk.bf16.vlgmr.msra.gmra.mrb[4].mxu1 %vm43_vm1, %v253_v5 }
 0x84b   :  { %752 = vmatpush3.bf16.msra.mxu1 %v869_v1  ;;  %755 = vmatprep.mubr.msk.bf16.mxu1 %vm841_vm0, %v840_v0 }
 0x84c   :  { %753 = vmatprep.subr.bf16.mxu1 %v840_v0 }
 0x84f   :  { %754 = vmatpush3.bf16.msra.mxu1 %v880_v2 }
 0x850   :  { %767 = vmatprep.subr.bf16.mxu1 %v840_v0 }
 0x91d   :  { %v291_v7 = vpop.f32.mrb[4].mxu1 }
 0x91e   :  { %v297_v8 = vadd.f32 %v291_v7, %v26_v6  ;;  %v741_v9 = vpop.f32.mrb[5].mxu1  ;;  %v29_v6 = vld [vmem:[%s1004_s0 + $0x30] sm:$0xff] }
 0x91f   :  { %v294_v10 = vpop.f32.mrb[6].mxu1 }
 0x920   :  { %810 = vtanh.f32 %v297_v8  ;;  %v742_v11 = vpop.f32.mrb[7].mxu1  ;;  %v298_v13 = vmul.f32 0.5, %v297_v8 }
 0x922   :  { %812 = vtanh.f32 %v298_v13 }
 0x92a   :  { %v811_v12 = vpop.eup %810 }
 0x92b   :  { %305 = vrot.lane.b32.xlu0 %v811_v12, %s843_s18 }
 0x92c   :  { %v813_v14 = vpop.eup %812 }
 0x92d   :  { %v300_v15 = vmul.f32 0.5, %v813_v14 }
 0x92f   :  { %v301_v16 = vadd.f32 0.5, %v300_v15 }
 0x931   :  { %v303_v19 = vmul.f32 %v301_v16, %v243_v61 }
 0x99d   :  { %v306_v17 = vpop.permute.xlu0 %305 }
 0x99e   :  { %v308_v18 = vmul.f32 %v306_v17, %v301_v16 }
 0x9a0   :  { %310 = vrot.lane.b32.xlu1 %v308_v18, %s844_s19 }
 0xa12   :  { %v311_v20 = vpop.permute.xlu1 %310 }
 0xa13   :  { %v313_v21 = vadd.f32 %v311_v20, %v303_v19 }
 0xa15   :  { %814 = vtanh.f32 %v313_v21 }
 0xa1f   :  { %v815_v22 = vpop.eup %814 }
 0xa20   :  { %316 = vrot.lane.b32.xlu0 %v815_v22, %s843_s18 }
 0xa92   :  { %v317_v23 = vpop.permute.xlu0 %316 }
 0xa93   :  { %v319_v24 = vmul.f32 %v317_v23, %v301_v16 }
 0xa95   :  { %v320_v25 = vpack.c.bf16 %v319_v24, %v319_v24 }
 0xa97   :  { %322 = vrot.lane.b32.xlu1 %v320_v25, %s844_s19 }
 0xb09   :  { %v323_v26 = vpop.permute.xlu1 %322 }
 0xb0a   :  { %748 = vmatmul.mubr.msk.bf16.vlgmr.msra.gmra.mrb[8].mxu0 %vm43_vm1, %v323_v26 }
 0xb0b   :  { %760 = vmatpush3.bf16.msra.mxu0 %v869_v1  ;;  %763 = vmatprep.mubr.msk.bf16.mxu0 %vm841_vm0, %v840_v0 }
 0xb0c   :  { %761 = vmatprep.subr.bf16.mxu0 %v840_v0 }
 0xb0f   :  { %762 = vmatpush3.bf16.msra.mxu0 %v880_v2 }
 0xb10   :  { %775 = vmatprep.subr.bf16.mxu0 %v840_v0 }
 0xbdd   :  { %v361_v28 = vpop.f32.mrb[8].mxu0 }
 0xbde   :  { %v367_v29 = vadd.f32 %v361_v28, %v27_v27  ;;  %v749_v30 = vpop.f32.mrb[9].mxu0  ;;  %v30_v27 = vld [vmem:[%s1004_s0 + $0x38] sm:$0xff] }
 0xbdf   :  { %v364_v31 = vpop.f32.mrb[10].mxu0 }
 0xbe0   :  { %816 = vtanh.f32 %v367_v29  ;;  %v750_v32 = vpop.f32.mrb[11].mxu0  ;;  %v368_v34 = vmul.f32 0.5, %v367_v29 }
 0xbe2   :  { %818 = vtanh.f32 %v368_v34 }
 0xbea   :  { %v817_v33 = vpop.eup %816 }
 0xbeb   :  { %375 = vrot.lane.b32.xlu0 %v817_v33, %s843_s18 }
 0xbec   :  { %v819_v35 = vpop.eup %818 }
 0xbed   :  { %v370_v36 = vmul.f32 0.5, %v819_v35 }
 0xbef   :  { %v371_v37 = vadd.f32 0.5, %v370_v36 }
 0xbf1   :  { %v373_v40 = vmul.f32 %v371_v37, %v313_v21 }
 0xc5d   :  { %v376_v38 = vpop.permute.xlu0 %375 }
 0xc5e   :  { %v378_v39 = vmul.f32 %v376_v38, %v371_v37 }
 0xc60   :  { %380 = vrot.lane.b32.xlu1 %v378_v39, %s844_s19 }
 0xcd2   :  { %v381_v41 = vpop.permute.xlu1 %380 }
 0xcd3   :  { %v383_v42 = vadd.f32 %v381_v41, %v373_v40 }
 0xcd5   :  { %820 = vtanh.f32 %v383_v42 }
 0xcdf   :  { %v821_v43 = vpop.eup %820 }
 0xce0   :  { %386 = vrot.lane.b32.xlu0 %v821_v43, %s843_s18  ;;  %v790_v43 = vld [vmem:[%s1003_s1 + $0x4] ss:$8 sps:$4 sm:$0xff]  }
 0xd52   :  { %v387_v44 = vpop.permute.xlu0 %386 }
 0xd53   :  { %v389_v45 = vmul.f32 %v387_v44, %v371_v37  ;;  %v791_v44 = vld [vmem:[%s1003_s1 + $0x14] ss:$8 sps:$4 sm:$0xff]  }
 0xd55   :  { %v390_v46 = vpack.c.bf16 %v389_v45, %v389_v45 }
 0xd57   :  { %392 = vrot.lane.b32.xlu1 %v390_v46, %s844_s19 }
 0xdc9   :  { %v393_v47 = vpop.permute.xlu1 %392 }
 0xdca   :  { %756 = vmatmul.mubr.msk.bf16.vlgmr.msra.gmra.mrb[8].mxu1 %vm43_vm1, %v393_v47 }
 0xdcb   :  { %768 = vmatpush3.bf16.msra.mxu1 %v869_v1  ;;  %771 = vmatprep.mubr.msk.bf16.mxu1 %vm841_vm0, %v840_v0 }
 0xdcc   :  { %769 = vmatprep.subr.bf16.mxu1 %v840_v0 }
 0xdcf   :  { %770 = vmatpush3.bf16.msra.mxu1 %v880_v2 }
 0xe9d   :  { %v431_v49 = vpop.f32.mrb[8].mxu1 }
 0xe9e   :  { %v437_v50 = vadd.f32 %v431_v49, %v28_v48  ;;  %v757_v51 = vpop.f32.mrb[9].mxu1 }
 0xe9f   :  { %v434_v52 = vpop.f32.mrb[10].mxu1 }
 0xea0   :  { %822 = vtanh.f32 %v437_v50  ;;  %v758_v53 = vpop.f32.mrb[11].mxu1  ;;  %v438_v1 = vmul.f32 0.5, %v437_v50  ;;  %v680_v50 = vld [vmem:[%s1005_s2] ss:$0 sm:$0xff] }
 0xea2   :  { %824 = vtanh.f32 %v438_v1 }
 0xeaa   :  { %v823_v54 = vpop.eup %822 }
 0xeab   :  { %445 = vrot.lane.b32.xlu0 %v823_v54, %s843_s18 }
 0xeac   :  { %v825_v55 = vpop.eup %824 }
 0xead   :  { %v440_v56 = vmul.f32 0.5, %v825_v55 }
 0xeaf   :  { %v441_v57 = vadd.f32 0.5, %v440_v56 }
 0xeb1   :  { %v443_v59 = vmul.f32 %v441_v57, %v383_v42 }
 0xf1d   :  { %v446_v58 = vpop.permute.xlu0 %445 }
 0xf1e   :  { %v448_v2 = vmul.f32 %v446_v58, %v441_v57 }
 0xf20   :  { %450 = vrot.lane.b32.xlu1 %v448_v2, %s844_s19 }
 0xf92   :  { %v451_v60 = vpop.permute.xlu1 %450 }
 0xf93   :  { %v453_v61 = vadd.f32 %v451_v60, %v443_v59 }
 0xf95   :  { %826 = vtanh.f32 %v453_v61 }
 0xf9f   :  { %v827_v62 = vpop.eup %826 }
 0xfa0   :  { %456 = vrot.lane.b32.xlu0 %v827_v62, %s843_s18 }
0x1012   :  { %v457_v63 = vpop.permute.xlu0 %456 }
0x1013   :  { %v459_v3 = vmul.f32 %v457_v63, %v441_v57 }
0x1015   :  { %v460_v4 = vpack.c.bf16 %v459_v3, %v459_v3 }
0x1017   :  { %462 = vrot.lane.b32.xlu1 %v460_v4, %s844_s19 }
0x1089   :  { %v463_v5 = vpop.permute.xlu1 %462 }
0x108a   :  { %764 = vmatmul.mubr.msk.bf16.vlgmr.msra.gmra.mrb[12].mxu0 %vm43_vm1, %v463_v5 }
0x108b   :  { %779 = vmatprep.mubr.msk.bf16.mxu0 %vm841_vm0, %v840_v0  ;;  %776 = vmatpush3.bf16.msra.mxu0 %v790_v43 }
0x108c   :  { %777 = vmatprep.subr.bf16.mxu0 %v840_v0 }
0x108f   :  { %778 = vmatpush3.bf16.msra.mxu0 %v791_v44 }
0x115d   :  { %v501_v7 = vpop.f32.mrb[12].mxu0 }
0x115e   :  { %v507_v8 = vadd.f32 %v501_v7, %v29_v6  ;;  %v765_v9 = vpop.f32.mrb[13].mxu0 }
0x115f   :  { %v504_v10 = vpop.f32.mrb[14].mxu0 }
0x1160   :  { %828 = vtanh.f32 %v507_v8  ;;  %v766_v11 = vpop.f32.mrb[15].mxu0  ;;  %v508_v13 = vmul.f32 0.5, %v507_v8 }
0x1162   :  { %830 = vtanh.f32 %v508_v13 }
0x116a   :  { %v829_v12 = vpop.eup %828 }
0x116b   :  { %515 = vrot.lane.b32.xlu0 %v829_v12, %s843_s18 }
0x116c   :  { %v831_v14 = vpop.eup %830 }
0x116d   :  { %v510_v15 = vmul.f32 0.5, %v831_v14 }
0x116f   :  { %v511_v16 = vadd.f32 0.5, %v510_v15 }
0x1171   :  { %v513_v19 = vmul.f32 %v511_v16, %v453_v61 }
0x11dd   :  { %v516_v17 = vpop.permute.xlu0 %515 }
0x11de   :  { %v518_v18 = vmul.f32 %v516_v17, %v511_v16 }
0x11e0   :  { %520 = vrot.lane.b32.xlu1 %v518_v18, %s844_s19 }
0x1252   :  { %v521_v20 = vpop.permute.xlu1 %520 }
0x1253   :  { %v523_v21 = vadd.f32 %v521_v20, %v513_v19 }
0x1255   :  { %832 = vtanh.f32 %v523_v21 }
0x125f   :  { %v833_v22 = vpop.eup %832 }
0x1260   :  { %526 = vrot.lane.b32.xlu0 %v833_v22, %s843_s18 }
0x12d2   :  { %v527_v23 = vpop.permute.xlu0 %526 }
0x12d3   :  { %v529_v24 = vmul.f32 %v527_v23, %v511_v16 }
0x12d5   :  { %v530_v25 = vpack.c.bf16 %v529_v24, %v529_v24 }
0x12d7   :  { %532 = vrot.lane.b32.xlu1 %v530_v25, %s844_s19 }
0x1349   :  { %v533_v26 = vpop.permute.xlu1 %532 }
0x134a   :  { %772 = vmatmul.mubr.msk.bf16.vlgmr.msra.gmra.mrb[12].mxu1 %vm43_vm1, %v533_v26 }
0x141d   :  { %v571_v28 = vpop.f32.mrb[12].mxu1 }
0x141e   :  { %v577_v29 = vadd.f32 %v571_v28, %v30_v27  ;;  %v773_v30 = vpop.f32.mrb[13].mxu1 }
0x141f   :  { %v574_v31 = vpop.f32.mrb[14].mxu1 }
0x1420   :  { %834 = vtanh.f32 %v577_v29  ;;  %v774_v32 = vpop.f32.mrb[15].mxu1  ;;  %v578_v34 = vmul.f32 0.5, %v577_v29 }
0x1422   :  { %836 = vtanh.f32 %v578_v34 }
0x142a   :  { %v835_v33 = vpop.eup %834 }
0x142b   :  { %585 = vrot.lane.b32.xlu0 %v835_v33, %s843_s18 }
0x142c   :  { %v837_v35 = vpop.eup %836 }
0x142d   :  { %v580_v36 = vmul.f32 0.5, %v837_v35 }
0x142f   :  { %v581_v37 = vadd.f32 0.5, %v580_v36 }
0x1431   :  { %v583_v40 = vmul.f32 %v581_v37, %v523_v21 }
0x149d   :  { %v586_v38 = vpop.permute.xlu0 %585 }
0x149e   :  { %v588_v39 = vmul.f32 %v586_v38, %v581_v37 }
0x14a0   :  { %590 = vrot.lane.b32.xlu1 %v588_v39, %s844_s19 }
0x1512   :  { %v591_v41 = vpop.permute.xlu1 %590 }
0x1513   :  { %v593_v42 = vadd.f32 %v591_v41, %v583_v40 }
0x1515   :  { %838 = vtanh.f32 %v593_v42 }
0x151f   :  { %v839_v45 = vpop.eup %838 }
0x1520   :  { %596 = vrot.lane.b32.xlu0 %v839_v45, %s843_s18 }
0x1592   :  { %v597_v46 = vpop.permute.xlu0 %596 }
0x1593   :  { %v599_v47 = vmul.f32 %v597_v46, %v581_v37 }
0x1595   :  { %v600_v48 = vpack.c.bf16 %v599_v47, %v599_v47 }
0x1597   :  { %609 = vrot.lane.b32.xlu1 %v600_v48, %s844_s19 }
0x1609   :  { %v610_v49 = vpop.permute.xlu1 %609 }
0x160a   :  { %780 = vmatmul.mubr.msk.bf16.vlgmr.msra.gmra.mrb[16].mxu0 %vm43_vm1, %v610_v49 }
0x16dd   :  { %v660_v51 = vpop.f32.mrb[16].mxu0 }
0x16de   :  { %v661_v52 = vadd.f32 %v680_v50, %v660_v51  ;;  %v781_v53 = vpop.f32.mrb[17].mxu0 }
0x16df   :  { %v663_v0 = vpop.f32.mrb[18].mxu0 }
0x16e0   :  { %666 = vst [vmem:[%s1006_s3] sm:$0xff] %v661_v52  ;;  %v782_v54 = vpop.f32.mrb[19].mxu0 }

</bundles_post_ra>
